<compile_context>
chip_gen: v7x
topology: tpu7x:2x2x1
jax: 0.10.0
libtpu: 0.0.40
codegen_flags: <defaults>
</compile_context>

<pallas_src>
import functools

import jax
import jax.numpy as jnp
from jax.experimental import pallas as pl
from jax.experimental.pallas import tpu as pltpu

EMBED_DIM = 128      # fixed by the module (nn.Embedding(output_size, 128))
_NEG_INF = -1e30     # padding value for padded vocab logits (not -inf to avoid overflow)


def _round_up(x, m):
    return ((x + m - 1) // m) * m


# ----------------------------------------------------------------------------- kernel
def _decoder_kernel(x_ref, h_ref, c_ref,
                    wih_ref, whh_ref, b_ref,
                    wout_ref, bout_ref,
                    logp_ref, hn_ref, cn_ref,
                    *, hidden_pad):
    """Single LSTM step + output projection + log-softmax, everything resident in VMEM.

    Shapes (all lane-dense, Hp/Vp multiples of 128, Bp multiple of 8):
      x: (Bp, 128)  h, c: (Bp, Hp)
      wih: (128, 4*Hp)  whh: (Hp, 4*Hp)  b: (1, 4*Hp)
      wout: (Hp, Vp)    bout: (1, Vp)
    """
    compute_dtype = wih_ref.dtype            # f32 or bf16 weights; accumulate in f32
    x = x_ref[...]
    h = h_ref[...]
    c = c_ref[...]

    # gates = x @ W_ih^T + h @ W_hh^T + (b_ih + b_hh)   -> (Bp, 4*Hp), f32 accumulation
    gates = (jnp.dot(x.astype(compute_dtype), wih_ref[...],
                     preferred_element_type=jnp.float32)
             + jnp.dot(h.astype(compute_dtype), whh_ref[...],
                       preferred_element_type=jnp.float32)
             + b_ref[...])

    Hp = hidden_pad  # each gate block is a full 128-lane-aligned slab -> no relayout
    i_g = jax.nn.sigmoid(gates[:, 0 * Hp:1 * Hp])
    f_g = jax.nn.sigmoid(gates[:, 1 * Hp:2 * Hp])
    g_g = jnp.tanh(gates[:, 2 * Hp:3 * Hp])
    o_g = jax.nn.sigmoid(gates[:, 3 * Hp:4 * Hp])

    c_new = f_g * c + i_g * g_g
    h_new = o_g * jnp.tanh(c_new)

    # output projection + log-softmax over the (padded) vocab dim
    logits = (jnp.dot(h_new.astype(compute_dtype), wout_ref[...],
                      preferred_element_type=jnp.float32)
              + bout_ref[...])                               # (Bp, Vp)
    m = jnp.max(logits, axis=-1, keepdims=True)
    shifted = logits - m
    lse = jnp.log(jnp.sum(jnp.exp(shifted), axis=-1, keepdims=True))

    logp_ref[...] = shifted - lse
    hn_ref[...] = h_new
    cn_ref[...] = c_new


# ----------------------------------------------------------------------------- wrapper
def _pad_gate_weight(w, H, H_pad, in_pad=None):
    """PyTorch (4H, In) gate-stacked weight -> transposed, per-gate-padded (In_pad, 4*H_pad)."""
    In = w.shape[1]
    w4 = w.reshape(4, H, In)                                    # (4, H, In) in i,f,g,o order
    w4 = jnp.pad(w4, ((0, 0), (0, H_pad - H), (0, 0)))          # (4, H_pad, In)
    wt = jnp.transpose(w4, (2, 0, 1)).reshape(In, 4 * H_pad)    # (In, 4*H_pad)
    if in_pad is not None and in_pad > In:
        wt = jnp.pad(wt, ((0, in_pad - In), (0, 0)))
    return wt


def decoder_lstm_forward(token_ids, hidden, params, *, weight_dtype=jnp.float32):
    """Mirrors DecoderLSTM.forward (one decode step).

    token_ids: int32 (B,)
    hidden: (h0, c0), each float32 (1, B, H)   (PyTorch nn.LSTM convention)
    returns: (log_probs (B, V), (h_n (1, B, H), c_n (1, B, H)))
    """
    h0, c0 = hidden
    B = token_ids.shape[0]
    H = h0.shape[-1]
    V = params["w_out"].shape[0]

    B_pad = _round_up(B, 8)
    H_pad = _round_up(H, 128)
    V_pad = _round_up(V, 128)

    # ---- glue: embedding lookup (padding_idx row already zeroed in the table) ----
    # TODO(synk): fuse this gather into the kernel (scalar-prefetched ids + pl.Element
    #             row BlockSpec on the embedding table) once the time loop lives in-kernel.
    x = jnp.take(params["embedding"], token_ids, axis=0)        # (B, 128)
    x_pad = jnp.pad(x, ((0, B_pad - B), (0, 0)))                # (Bp, 128)

    h0_pad = jnp.pad(h0.reshape(B, H), ((0, B_pad - B), (0, H_pad - H)))
    c0_pad = jnp.pad(c0.reshape(B, H), ((0, B_pad - B), (0, H_pad - H)))

    # ---- weights: pre-transposed to [in, out], lane-padded, optionally compressed ----
    wih_t = _pad_gate_weight(params["w_ih"], H, H_pad).astype(weight_dtype)           # (128, 4Hp)
    whh_t = _pad_gate_weight(params["w_hh"], H, H_pad, in_pad=H_pad).astype(weight_dtype)  # (Hp, 4Hp)
    b = (params["b_ih"] + params["b_hh"]).reshape(4, H)
    b = jnp.pad(b, ((0, 0), (0, H_pad - H))).reshape(1, 4 * H_pad).astype(jnp.float32)

    wout_t = jnp.pad(params["w_out"].T,
                     ((0, H_pad - H), (0, V_pad - V))).astype(weight_dtype)            # (Hp, Vp)
    bout = jnp.pad(params["b_out"], (0, V_pad - V),
                   constant_values=_NEG_INF).reshape(1, V_pad).astype(jnp.float32)     # (1, Vp)

    vmem = pl.BlockSpec(memory_space=pltpu.MemorySpace.VMEM)

    kernel = functools.partial(_decoder_kernel, hidden_pad=H_pad)
    logp_pad, hn_pad, cn_pad = pl.pallas_call(
        kernel,
        out_shape=(
            jax.ShapeDtypeStruct((B_pad, V_pad), jnp.float32),
            jax.ShapeDtypeStruct((B_pad, H_pad), jnp.float32),
            jax.ShapeDtypeStruct((B_pad, H_pad), jnp.float32),
        ),
        in_specs=[vmem] * 8,
        out_specs=(vmem, vmem, vmem),
    )(x_pad, h0_pad, c0_pad, wih_t, whh_t, b, wout_t, bout)

    logp = logp_pad[:B, :V]
    h_n = hn_pad[:B, :H].reshape(1, B, H)
    c_n = cn_pad[:B, :H].reshape(1, B, H)
    return logp, (h_n, c_n)


# ----------------------------------------------------------------------------- params & ref
def init_params(key, hidden_size, output_size):
    ks = jax.random.split(key, 7)
    scale = 0.1
    emb = scale * jax.random.normal(ks[0], (output_size, EMBED_DIM), jnp.float32)
    emb = emb.at[1].set(0.0)  # padding_idx=1 row is zeros in nn.Embedding
    return {
        "embedding": emb,
        "w_ih": scale * jax.random.normal(ks[1], (4 * hidden_size, EMBED_DIM), jnp.float32),
        "w_hh": scale * jax.random.normal(ks[2], (4 * hidden_size, hidden_size), jnp.float32),
        "b_ih": scale * jax.random.normal(ks[3], (4 * hidden_size,), jnp.float32),
        "b_hh": scale * jax.random.normal(ks[4], (4 * hidden_size,), jnp.float32),
        "w_out": scale * jax.random.normal(ks[5], (output_size, hidden_size), jnp.float32),
        "b_out": scale * jax.random.normal(ks[6], (output_size,), jnp.float32),
    }


def _reference_forward(token_ids, hidden, params):
    # pure-JAX reference for a sanity check
    h0, c0 = hidden
    B = token_ids.shape[0]
    H = h0.shape[-1]
    x = jnp.take(params["embedding"], token_ids, axis=0)
    h = h0.reshape(B, H)
    c = c0.reshape(B, H)
    gates = (x @ params["w_ih"].T + params["b_ih"]
             + h @ params["w_hh"].T + params["b_hh"])
    i_g = jax.nn.sigmoid(gates[:, 0 * H:1 * H])
    f_g = jax.nn.sigmoid(gates[:, 1 * H:2 * H])
    g_g = jnp.tanh(gates[:, 2 * H:3 * H])
    o_g = jax.nn.sigmoid(gates[:, 3 * H:4 * H])
    c_new = f_g * c + i_g * g_g
    h_new = o_g * jnp.tanh(c_new)
    logits = h_new @ params["w_out"].T + params["b_out"]
    logp = jax.nn.log_softmax(logits, axis=-1)
    return logp, (h_new.reshape(1, B, H), c_new.reshape(1, B, H))


# ----------------------------------------------------------------------------- demo
if __name__ == "__main__":
    B = 2            # batch
    HIDDEN = 32      # hidden_size
    VOCAB = 64       # output_size

    key = jax.random.PRNGKey(0)
    pkey, tkey, hkey, ckey = jax.random.split(key, 4)

    params = init_params(pkey, HIDDEN, VOCAB)
    token_ids = jax.random.randint(tkey, (B,), 0, VOCAB, dtype=jnp.int32)
    h0 = 0.1 * jax.random.normal(hkey, (1, B, HIDDEN), jnp.float32)
    c0 = 0.1 * jax.random.normal(ckey, (1, B, HIDDEN), jnp.float32)

    # f32 weights: exact match with the reference
    logp, (h_n, c_n) = decoder_lstm_forward(token_ids, (h0, c0), params)
    jax.block_until_ready((logp, h_n, c_n))

    ref_logp, (ref_h, ref_c) = _reference_forward(token_ids, (h0, c0), params)
    assert logp.shape == (B, VOCAB) and h_n.shape == (1, B, HIDDEN) and c_n.shape == (1, B, HIDDEN)
    assert jnp.allclose(logp, ref_logp, atol=1e-5)
    assert jnp.allclose(h_n, ref_h, atol=1e-5)
    assert jnp.allclose(c_n, ref_c, atol=1e-5)

    # bf16-compressed weights (bandwidth optimization): same semantics, loose tolerance
    logp_bf16, (h_bf16, c_bf16) = decoder_lstm_forward(
        token_ids, (h0, c0), params, weight_dtype=jnp.bfloat16)
    jax.block_until_ready((logp_bf16, h_bf16, c_bf16))
    assert jnp.allclose(logp_bf16, ref_logp, atol=5e-2)
    assert jnp.allclose(h_bf16, ref_h, atol=5e-2)
    assert jnp.allclose(c_bf16, ref_c, atol=5e-2)

    print("KERNEL_OK")
</pallas_src>

<mosaic_0001>
module attributes {stable_mosaic.version = 11 : i64} {
  func.func @_decoder_kernel(%arg0: memref<8x128xf32, #tpu.memory_space<vmem>>, %arg1: memref<8x128xf32, #tpu.memory_space<vmem>>, %arg2: memref<8x128xf32, #tpu.memory_space<vmem>>, %arg3: memref<128x512xf32, #tpu.memory_space<vmem>>, %arg4: memref<128x512xf32, #tpu.memory_space<vmem>>, %arg5: memref<1x512xf32, #tpu.memory_space<vmem>>, %arg6: memref<128x128xf32, #tpu.memory_space<vmem>>, %arg7: memref<1x128xf32, #tpu.memory_space<vmem>>, %arg8: memref<8x128xf32, #tpu.memory_space<vmem>>, %arg9: memref<8x128xf32, #tpu.memory_space<vmem>>, %arg10: memref<8x128xf32, #tpu.memory_space<vmem>>) attributes {dimension_semantics = [], scalar_prefetch = 0 : i64, scratch_operands = 0 : i64, tpu.core_type = #tpu.core_type<tc>} {
    %c0 = arith.constant 0 : index
    %c0_0 = arith.constant 0 : index
    %0 = vector.load %arg0[%c0, %c0_0] : memref<8x128xf32, #tpu.memory_space<vmem>>, vector<8x128xf32>
    %c0_1 = arith.constant 0 : index
    %c0_2 = arith.constant 0 : index
    %1 = vector.load %arg1[%c0_1, %c0_2] : memref<8x128xf32, #tpu.memory_space<vmem>>, vector<8x128xf32>
    %c0_3 = arith.constant 0 : index
    %c0_4 = arith.constant 0 : index
    %2 = vector.load %arg2[%c0_3, %c0_4] : memref<8x128xf32, #tpu.memory_space<vmem>>, vector<8x128xf32>
    %c0_5 = arith.constant 0 : index
    %c0_6 = arith.constant 0 : index
    %3 = vector.load %arg3[%c0_5, %c0_6] : memref<128x512xf32, #tpu.memory_space<vmem>>, vector<128x512xf32>
    %cst = arith.constant dense<0.000000e+00> : vector<8x512xf32>
    %4 = tpu.matmul %0, %3, %cst {dimension_numbers = #tpu.dot_dimension_numbers<[1], [0], [0], [1], [0, 0, 1, 1], [], []>} : vector<8x128xf32>, vector<128x512xf32>, vector<8x512xf32> -> vector<8x512xf32>
    %c0_7 = arith.constant 0 : index
    %c0_8 = arith.constant 0 : index
    %5 = vector.load %arg4[%c0_7, %c0_8] : memref<128x512xf32, #tpu.memory_space<vmem>>, vector<128x512xf32>
    %cst_9 = arith.constant dense<0.000000e+00> : vector<8x512xf32>
    %6 = tpu.matmul %1, %5, %cst_9 {dimension_numbers = #tpu.dot_dimension_numbers<[1], [0], [0], [1], [0, 0, 1, 1], [], []>} : vector<8x128xf32>, vector<128x512xf32>, vector<8x512xf32> -> vector<8x512xf32>
    %7 = arith.addf %4, %6 : vector<8x512xf32>
    %c0_10 = arith.constant 0 : index
    %c0_11 = arith.constant 0 : index
    %8 = vector.load %arg5[%c0_10, %c0_11] : memref<1x512xf32, #tpu.memory_space<vmem>>, vector<1x512xf32>
    %9 = vector.broadcast %8 : vector<1x512xf32> to vector<8x512xf32>
    %10 = arith.addf %7, %9 : vector<8x512xf32>
    %11 = vector.extract_strided_slice %10 {offsets = [0, 0], sizes = [8, 128], strides = [1, 1]} : vector<8x512xf32> to vector<8x128xf32>
    %12 = arith.negf %11 : vector<8x128xf32>
    %13 = math.exp %12 : vector<8x128xf32>
    %cst_12 = arith.constant 1.000000e+00 : f32
    %14 = vector.broadcast %cst_12 : f32 to vector<8x128xf32>
    %15 = arith.addf %14, %13 : vector<8x128xf32>
    %16 = arith.divf %14, %15 : vector<8x128xf32>
    %17 = vector.extract_strided_slice %10 {offsets = [0, 128], sizes = [8, 128], strides = [1, 1]} : vector<8x512xf32> to vector<8x128xf32>
    %18 = arith.negf %17 : vector<8x128xf32>
    %19 = math.exp %18 : vector<8x128xf32>
    %cst_13 = arith.constant 1.000000e+00 : f32
    %20 = vector.broadcast %cst_13 : f32 to vector<8x128xf32>
    %21 = arith.addf %20, %19 : vector<8x128xf32>
    %22 = arith.divf %20, %21 : vector<8x128xf32>
    %23 = vector.extract_strided_slice %10 {offsets = [0, 256], sizes = [8, 128], strides = [1, 1]} : vector<8x512xf32> to vector<8x128xf32>
    %24 = math.tanh %23 : vector<8x128xf32>
    %25 = vector.extract_strided_slice %10 {offsets = [0, 384], sizes = [8, 128], strides = [1, 1]} : vector<8x512xf32> to vector<8x128xf32>
    %26 = arith.negf %25 : vector<8x128xf32>
    %27 = math.exp %26 : vector<8x128xf32>
    %cst_14 = arith.constant 1.000000e+00 : f32
    %28 = vector.broadcast %cst_14 : f32 to vector<8x128xf32>
    %29 = arith.addf %28, %27 : vector<8x128xf32>
    %30 = arith.divf %28, %29 : vector<8x128xf32>
    %31 = arith.mulf %22, %2 : vector<8x128xf32>
    %32 = arith.mulf %16, %24 : vector<8x128xf32>
    %33 = arith.addf %31, %32 : vector<8x128xf32>
    %34 = math.tanh %33 : vector<8x128xf32>
    %35 = arith.mulf %30, %34 : vector<8x128xf32>
    %c0_15 = arith.constant 0 : index
    %c0_16 = arith.constant 0 : index
    %36 = vector.load %arg6[%c0_15, %c0_16] : memref<128x128xf32, #tpu.memory_space<vmem>>, vector<128x128xf32>
    %cst_17 = arith.constant dense<0.000000e+00> : vector<8x128xf32>
    %37 = tpu.matmul %35, %36, %cst_17 {dimension_numbers = #tpu.dot_dimension_numbers<[1], [0], [0], [1], [0, 0, 1, 1], [], []>} : vector<8x128xf32>, vector<128x128xf32>, vector<8x128xf32> -> vector<8x128xf32>
    %c0_18 = arith.constant 0 : index
    %c0_19 = arith.constant 0 : index
    %38 = vector.load %arg7[%c0_18, %c0_19] : memref<1x128xf32, #tpu.memory_space<vmem>>, vector<1x128xf32>
    %39 = vector.broadcast %38 : vector<1x128xf32> to vector<8x128xf32>
    %40 = arith.addf %37, %39 : vector<8x128xf32>
    %cst_20 = arith.constant dense<0xFF800000> : vector<8xf32>
    %41 = vector.multi_reduction <maximumf>, %40, %cst_20 [1] : vector<8x128xf32> to vector<8xf32>
    %42 = vector.shape_cast %41 : vector<8xf32> to vector<8x1xf32>
    %43 = vector.broadcast %42 : vector<8x1xf32> to vector<8x128xf32>
    %44 = arith.subf %40, %43 : vector<8x128xf32>
    %45 = math.exp %44 : vector<8x128xf32>
    %cst_21 = arith.constant dense<0.000000e+00> : vector<8xf32>
    %46 = vector.multi_reduction <add>, %45, %cst_21 [1] : vector<8x128xf32> to vector<8xf32>
    %47 = vector.shape_cast %46 : vector<8xf32> to vector<8x1xf32>
    %48 = math.log %47 : vector<8x1xf32>
    %49 = vector.broadcast %48 : vector<8x1xf32> to vector<8x128xf32>
    %50 = arith.subf %44, %49 : vector<8x128xf32>
    %c0_22 = arith.constant 0 : index
    %c0_23 = arith.constant 0 : index
    %51 = vector.load %arg8[%c0_22, %c0_23] : memref<8x128xf32, #tpu.memory_space<vmem>>, vector<8x128xf32>
    tpu.vector_store %arg8[%c0_22, %c0_23], %50 {strides = array<i32>} : memref<8x128xf32, #tpu.memory_space<vmem>>, vector<8x128xf32>,
    %c0_24 = arith.constant 0 : index
    %c0_25 = arith.constant 0 : index
    %52 = vector.load %arg9[%c0_24, %c0_25] : memref<8x128xf32, #tpu.memory_space<vmem>>, vector<8x128xf32>
    tpu.vector_store %arg9[%c0_24, %c0_25], %35 {strides = array<i32>} : memref<8x128xf32, #tpu.memory_space<vmem>>, vector<8x128xf32>,
    %c0_26 = arith.constant 0 : index
    %c0_27 = arith.constant 0 : index
    %53 = vector.load %arg10[%c0_26, %c0_27] : memref<8x128xf32, #tpu.memory_space<vmem>>, vector<8x128xf32>
    tpu.vector_store %arg10[%c0_26, %c0_27], %33 {strides = array<i32>} : memref<8x128xf32, #tpu.memory_space<vmem>>, vector<8x128xf32>,
    return
  }
}

</mosaic_0001>

<bundles_post_ra>
// kernel: tpu_custom_call.1
= control target key start
LH: loop header
LB: loop body
LE: loop exit
PB: predicated region body
PF: predicated region fallthrough
CT: control target
= control target key end

     0   :  { %16 = vsyncpa [#allocation3], 0  ;;  %s1394_s0 = inlined_call_operand.hbm [shape: f32[8,128], index: 0, kind: input, shape index: {}]   ;;  %s1395_s1 = inlined_call_operand.hbm [shape: f32[8,128], index: 1, kind: input, shape index: {}]   ;;  %s1396_s2 = inlined_call_operand.hbm [shape: f32[8,128], index: 2, kind: input, shape index: {}]   ;;  %s1397_s3 = inlined_call_operand.hbm [shape: f32[128,512], index: 3, kind: input, shape index: {}]   ;;  %s1398_s4 = inlined_call_operand.hbm [shape: f32[128,512], index: 4, kind: input, shape index: {}]   ;;  %s1399_s5 = inlined_call_operand.vmem [shape: f32[1,512], index: 5, kind: input, shape index: {}]   ;;  %s1400_s6 = inlined_call_operand.hbm [shape: f32[128,128], index: 6, kind: input, shape index: {}]   ;;  %s1401_s7 = inlined_call_operand.vmem [shape: f32[1,128], index: 7, kind: input, shape index: {}]   ;;  %s1402_s8 = inlined_call_operand.hbm [shape: f32[8,128], index: 8, kind: output, shape index: {0}]   ;;  %s1403_s9 = inlined_call_operand.hbm [shape: f32[8,128], index: 9, kind: output, shape index: {1}]   ;;  %s1404_s10 = inlined_call_operand.hbm [shape: f32[8,128], index: 10, kind: output, shape index: {2}]  }
   0x1   :  { %17 = vsyncpa [#allocation6], 0 }
   0x2   :  { %18 = vsyncpa [#allocation9], 0 }
   0x3   :  { %19 = vsyncpa [#allocation12], 0 }
   0x4   :  { %20 = vsyncpa [#allocation4], 0 }
   0x5   :  { %21 = vsyncpa [#allocation15], 0  ;;  %s1184_s13 = smov [#allocation5]   ;;  %s1185_s15 = smov [#allocation8]  }
   0x6   :  { %s38_s14 = sshll.u32 %s1184_s13, 4  ;;  %s57_s16 = sshll.u32 %s1185_s15, 4  ;;  %s39_s14 = int_to_ptr.vmem [resolvable:$true] %s38_s14  ;;  %s1255_s16 = int_to_ptr.vmem [resolvable:$true] %s57_s16 }
   0x7   :  { %s974_s19 = scalar_lea.hbm %s1395_s1, 128 }
   0x8   :  { %p975_p0 = scmp.ne.s32.totalorder %s1395_s1, %s974_s19  ;;  %p978_p1 = scmp.lt.u32.totalorder %s974_s19, %s1395_s1 }
   0xa   :  { %p980_p2 = pnand %p978_p1, %p975_p0 }
   0xc   :  { %983 = shalt.err (!%p980_p2)
}
   0xd   :  { %s984_s24 = scalar_lea.vmem %s39_s14, 128  ;;  %p989_p4 = scmp.lt.s32.totalorder %s39_s14, %s39_s14 }
   0xe   :  { %p985_p3 = scmp.ne.s32.totalorder %s39_s14, %s984_s24  ;;  %p990_p5 = scmp.lt.s32.totalorder %s984_s24, %s984_s24 }
  0x10   :  { %p991_p6 = por %p990_p5, %p989_p4 }
  0x12   :  { %p992_p7 = pnand %p991_p6, %p985_p3 }
  0x14   :  { %995 = shalt.err (!%p992_p7)
}
  0x15   :  { %41 = dma.hbm_to_vmem [thread:$0]  %s1395_s1, 128, %s39_s14, [#allocation6]  }
  0x16   :  { %s996_s29 = scalar_lea.hbm %s1397_s3, 8192 }
  0x17   :  { %p997_p8 = scmp.ne.s32.totalorder %s1397_s3, %s996_s29  ;;  %p1000_p9 = scmp.lt.u32.totalorder %s996_s29, %s1397_s3 }
  0x19   :  { %p1002_p10 = pnand %p1000_p9, %p997_p8 }
  0x1b   :  { %1005 = shalt.err (!%p1002_p10)
}
  0x1c   :  { %s1006_s15 = scalar_lea.vmem %s1255_s16, 8192  ;;  %p1011_p12 = scmp.lt.s32.totalorder %s1255_s16, %s1255_s16 }
  0x1d   :  { %p1007_p11 = scmp.ne.s32.totalorder %s1255_s16, %s1006_s15  ;;  %p1012_p13 = scmp.lt.s32.totalorder %s1006_s15, %s1006_s15 }
  0x1f   :  { %p1013_p0 = por %p1012_p13, %p1011_p12 }
  0x21   :  { %p1014_p1 = pnand %p1013_p0, %p1007_p11 }
  0x23   :  { %1017 = shalt.err (!%p1014_p1)
}
  0x24   :  { %s1186_s1 = smov 512   ;;  %s1187_s14 = smov 32  }
  0x25   :  { %63 = dma.hbm_to_vmem [thread:$0]  %s1397_s3, 8192, %s1255_s16, [#allocation9], %s1186_s1, %s1186_s1, %s1187_s14  }
  0x26   :  { %s1188_s19 = smov [#allocation2]   ;;  %s1189_s21 = smov [#allocation7]  }
  0x27   :  { %s28_s20 = sshll.u32 %s1188_s19, 4  ;;  %s48_s22 = sshll.u32 %s1189_s21, 4  ;;  %s29_s20 = int_to_ptr.vmem [resolvable:$true] %s28_s20  ;;  %s49_s22 = int_to_ptr.vmem [resolvable:$true] %s48_s22 }
  0x28   :  { %s1018_s25 = scalar_lea.hbm %s1394_s0, 128 }
  0x29   :  { %p1019_p2 = scmp.ne.s32.totalorder %s1394_s0, %s1018_s25  ;;  %p1022_p3 = scmp.lt.u32.totalorder %s1018_s25, %s1394_s0 }
  0x2b   :  { %p1024_p4 = pnand %p1022_p3, %p1019_p2 }
  0x2d   :  { %1027 = shalt.err (!%p1024_p4)
}
  0x2e   :  { %s1028_s3 = scalar_lea.vmem %s29_s20, 128  ;;  %p1033_p6 = scmp.lt.s32.totalorder %s29_s20, %s29_s20 }
  0x2f   :  { %p1029_p5 = scmp.ne.s32.totalorder %s29_s20, %s1028_s3  ;;  %p1034_p7 = scmp.lt.s32.totalorder %s1028_s3, %s1028_s3 }
  0x31   :  { %p1035_p8 = por %p1034_p7, %p1033_p6 }
  0x33   :  { %p1036_p9 = pnand %p1035_p8, %p1029_p5 }
  0x35   :  { %1039 = shalt.err (!%p1036_p9)
}
  0x36   :  { %31 = dma.hbm_to_vmem [thread:$0]  %s1394_s0, 128, %s29_s20, [#allocation3]  }
  0x37   :  { %s1040_s13 = scalar_lea.hbm %s1396_s2, 128 }
  0x38   :  { %p1041_p10 = scmp.ne.s32.totalorder %s1396_s2, %s1040_s13  ;;  %p1044_p11 = scmp.lt.u32.totalorder %s1040_s13, %s1396_s2 }
  0x3a   :  { %p1046_p12 = pnand %p1044_p11, %p1041_p10 }
  0x3c   :  { %1049 = shalt.err (!%p1046_p12)
}
  0x3d   :  { %s1050_s21 = scalar_lea.vmem %s49_s22, 128  ;;  %p1055_p0 = scmp.lt.s32.totalorder %s49_s22, %s49_s22 }
  0x3e   :  { %p1051_p13 = scmp.ne.s32.totalorder %s49_s22, %s1050_s21  ;;  %p1056_p1 = scmp.lt.s32.totalorder %s1050_s21, %s1050_s21 }
  0x40   :  { %p1057_p2 = por %p1056_p1, %p1055_p0 }
  0x42   :  { %p1058_p3 = pnand %p1057_p2, %p1051_p13 }
  0x44   :  { %1061 = shalt.err (!%p1058_p3)
}
  0x45   :  { %51 = dma.hbm_to_vmem [thread:$0]  %s1396_s2, 128, %s49_s22, [#allocation6]  }
  0x46   :  { %s1190_s23 = smov [#allocation10]   ;;  %s1191_s25 = smov [#allocation11]  }
  0x47   :  { %s69_s24 = sshll.u32 %s1190_s23, 4  ;;  %s83_s26 = sshll.u32 %s1191_s25, 4  ;;  %s70_s24 = int_to_ptr.vmem [resolvable:$true] %s69_s24  ;;  %s1313_s26 = int_to_ptr.vmem [resolvable:$true] %s83_s26 }
  0x48   :  { %s1062_s29 = scalar_lea.hbm %s1398_s4, 8192 }
  0x49   :  { %p1063_p4 = scmp.ne.s32.totalorder %s1398_s4, %s1062_s29  ;;  %p1066_p5 = scmp.lt.u32.totalorder %s1062_s29, %s1398_s4 }
  0x4b   :  { %p1068_p6 = pnand %p1066_p5, %p1063_p4 }
  0x4d   :  { %1071 = shalt.err (!%p1068_p6)
}
  0x4e   :  { %s1072_s2 = scalar_lea.vmem %s70_s24, 8192  ;;  %p1077_p8 = scmp.lt.s32.totalorder %s70_s24, %s70_s24 }
  0x4f   :  { %p1073_p7 = scmp.ne.s32.totalorder %s70_s24, %s1072_s2  ;;  %p1078_p9 = scmp.lt.s32.totalorder %s1072_s2, %s1072_s2 }
  0x51   :  { %p1079_p10 = por %p1078_p9, %p1077_p8 }
  0x53   :  { %p1080_p11 = pnand %p1079_p10, %p1073_p7 }
  0x55   :  { %1083 = shalt.err (!%p1080_p11)
}
  0x56   :  { %75 = dma.hbm_to_vmem [thread:$0]  %s1398_s4, 8192, %s70_s24, [#allocation9], %s1186_s1, %s1186_s1, %s1187_s14  }
  0x57   :  { %s1084_s17 = scalar_lea.hbm %s1400_s6, 2048 }
  0x58   :  { %p1085_p12 = scmp.ne.s32.totalorder %s1400_s6, %s1084_s17  ;;  %p1088_p13 = scmp.lt.u32.totalorder %s1084_s17, %s1400_s6 }
  0x5a   :  { %p1090_p0 = pnand %p1088_p13, %p1085_p12 }
  0x5c   :  { %1093 = shalt.err (!%p1090_p0)
}
  0x5d   :  { %s1094_s20 = scalar_lea.vmem %s1313_s26, 2048  ;;  %p1099_p2 = scmp.lt.s32.totalorder %s1313_s26, %s1313_s26 }
  0x5e   :  { %p1095_p1 = scmp.ne.s32.totalorder %s1313_s26, %s1094_s20  ;;  %p1100_p3 = scmp.lt.s32.totalorder %s1094_s20, %s1094_s20 }
  0x60   :  { %p1101_p4 = por %p1100_p3, %p1099_p2 }
  0x62   :  { %p1102_p5 = pnand %p1101_p4, %p1095_p1 }
  0x64   :  { %1105 = shalt.err (!%p1102_p5)
}
  0x65   :  { %s1192_s4 = smov 128   ;;  %s1193_s1 = smov 8  }
  0x66   :  { %89 = dma.hbm_to_vmem [thread:$0]  %s1400_s6, 2048, %s1313_s26, [#allocation12], %s1192_s4, %s1192_s4, %s1193_s1  }
  0x67   :  { %1172 = dma.done.wait [#allocation3], 128  }
  0x68   :  { %1173 = vsyncadd [#allocation3], 4294967168 }
  0x69   :  { %1174 = dma.done.wait [#allocation6], 256  }
  0x6a   :  { %1175 = vsyncadd [#allocation6], 4294967040 }
  0x6b   :  { %1176 = dma.done.wait [#allocation9], 16384  }
  0x6c   :  { %1177 = vsyncadd [#allocation9], 4294950912 }
  0x6d   :  { %1178 = dma.done.wait [#allocation12], 2048  }
  0x6e   :  { %1179 = vsyncadd [#allocation12], 4294965248  ;;  %v1194_v0 = vmov 0.0   ;;  %v178_v1 = vld [vmem:[#allocation10 + $0x8] sm:$0xff]  ;;  %v180_v3 = vld [vmem:[#allocation10 + $0x18] sm:$0xff]  ;;  %vm1196_vm0 = vmmov 0  }
  0x6f   :  { %305 = vmatprep.mubr.f32.mxu0 %v1194_v0  ;;  %376 = vmatprep.mubr.f32.mxu1 %v1194_v0  ;;  %v182_v2 = vld [vmem:[#allocation10 + $0x28] sm:$0xff]  ;;  %v184_v5 = vld [vmem:[#allocation10 + $0x38] sm:$0xff]  ;;  %v177_v6 = vld [vmem:[#allocation10] sm:$0xff]  ;;  %s1197_s26 = smov [#allocation14]  }
  0x70   :  { %v782_v4 = vpack.c.bf16 %v182_v2, %v178_v1  ;;  %v181_v7 = vld [vmem:[#allocation10 + $0x20] sm:$0xff]  ;;  %v814_v8 = vpack.c.bf16 %v184_v5, %v180_v3  ;;  %v179_v10 = vld [vmem:[#allocation10 + $0x10] sm:$0xff]  ;;  %v186_v12 = vld [vmem:[#allocation10 + $0x48] sm:$0xff]  ;;  %s697_s27 = sshll.u32 %s1197_s26, 4  ;;  %s698_s27 = int_to_ptr.vmem [resolvable:$true] %s697_s27 }
  0x71   :  { %v784_v9 = vpack.c.bf16 %v181_v7, %v177_v6  ;;  %v183_v11 = vld [vmem:[#allocation10 + $0x30] sm:$0xff]  ;;  %v190_v14 = vld [vmem:[#allocation10 + $0x68] sm:$0xff]  ;;  %v188_v15 = vld [vmem:[#allocation10 + $0x58] sm:$0xff]  ;;  %s1106_s28 = scalar_lea.vmem %s698_s27, 128  ;;  %p1111_p7 = scmp.lt.s32.totalorder %s698_s27, %s698_s27 }
  0x72   :  { %783 = vmatprep.subr.bf16.mxu0 %v782_v4  ;;  %v816_v13 = vpack.c.bf16 %v183_v11, %v179_v10  ;;  %v192_v16 = vld [vmem:[#allocation10 + $0x78] sm:$0xff]  ;;  %815 = vmatprep.subr.bf16.mxu1 %v814_v8  ;;  %v786_v17 = vpack.c.bf16 %v190_v14, %v186_v12  ;;  %v185_v19 = vld [vmem:[#allocation10 + $0x40] sm:$0xff]  ;;  %v187_v21 = vld [vmem:[#allocation10 + $0x50] sm:$0xff]  ;;  %p1107_p6 = scmp.ne.s32.totalorder %s698_s27, %s1106_s28  ;;  %p1112_p8 = scmp.lt.s32.totalorder %s1106_s28, %s1106_s28 }
  0x73   :  { %785 = vmatpush1.bf16.msra.mxu0 %v784_v9  ;;  %v818_v18 = vpack.c.bf16 %v192_v16, %v188_v15  ;;  %v189_v20 = vld [vmem:[#allocation10 + $0x60] sm:$0xff]  ;;  %v191_v23 = vld [vmem:[#allocation10 + $0x70] sm:$0xff]  ;;  %v194_v24 = vld [vmem:[#allocation10 + $0x88] sm:$0xff] }
  0x74   :  { %817 = vmatpush1.bf16.msra.mxu1 %v816_v13  ;;  %v788_v22 = vpack.c.bf16 %v189_v20, %v185_v19  ;;  %v198_v25 = vld [vmem:[#allocation10 + $0xa8] sm:$0xff]  ;;  %787 = vmatprep.subr.bf16.mxu0 %v786_v17  ;;  %v820_v26 = vpack.c.bf16 %v191_v23, %v187_v21  ;;  %v196_v28 = vld [vmem:[#allocation10 + $0x98] sm:$0xff]  ;;  %v193_v30 = vld [vmem:[#allocation10 + $0x80] sm:$0xff]  ;;  %p1113_p9 = por %p1112_p8, %p1111_p7 }
  0x75   :  { %819 = vmatprep.subr.bf16.mxu1 %v818_v18  ;;  %v790_v27 = vpack.c.bf16 %v198_v25, %v194_v24  ;;  %v200_v29 = vld [vmem:[#allocation10 + $0xb8] sm:$0xff]  ;;  %v197_v32 = vld [vmem:[#allocation10 + $0xa0] sm:$0xff]  ;;  %v195_v33 = vld [vmem:[#allocation10 + $0x90] sm:$0xff] }
  0x76   :  { %v822_v31 = vpack.c.bf16 %v200_v29, %v196_v28  ;;  %v199_v34 = vld [vmem:[#allocation10 + $0xb0] sm:$0xff]  ;;  %v792_v35 = vpack.c.bf16 %v197_v32, %v193_v30  ;;  %v202_v36 = vld [vmem:[#allocation10 + $0xc8] sm:$0xff]  ;;  %v204_v38 = vld [vmem:[#allocation10 + $0xd8] sm:$0xff]  ;;  %p1114_p10 = pnand %p1113_p9, %p1107_p6 }
  0x77   :  { %789 = vmatpush1.bf16.msra.mxu0 %v788_v22  ;;  %v206_v37 = vld [vmem:[#allocation10 + $0xe8] sm:$0xff]  ;;  %v824_v39 = vpack.c.bf16 %v199_v34, %v195_v33  ;;  %v208_v41 = vld [vmem:[#allocation10 + $0xf8] sm:$0xff]  ;;  %v201_v42 = vld [vmem:[#allocation10 + $0xc0] sm:$0xff] }
  0x78   :  { %821 = vmatpush1.bf16.msra.mxu1 %v820_v26  ;;  %791 = vmatprep.subr.bf16.mxu0 %v790_v27  ;;  %v794_v40 = vpack.c.bf16 %v206_v37, %v202_v36  ;;  %v205_v43 = vld [vmem:[#allocation10 + $0xe0] sm:$0xff]  ;;  %v826_v44 = vpack.c.bf16 %v208_v41, %v204_v38  ;;  %v203_v45 = vld [vmem:[#allocation10 + $0xd0] sm:$0xff]  ;;  %v210_v47 = vld [vmem:[#allocation10 + $0x108] sm:$0xff] }
  0x79   :  { %823 = vmatprep.subr.bf16.mxu1 %v822_v31  ;;  %v207_v46 = vld [vmem:[#allocation10 + $0xf0] sm:$0xff]  ;;  %v214_v48 = vld [vmem:[#allocation10 + $0x128] sm:$0xff]  ;;  %v212_v49 = vld [vmem:[#allocation10 + $0x118] sm:$0xff]  ;;  %v796_v51 = vpack.c.bf16 %v205_v43, %v201_v42 }
  0x7a   :  { %v216_v50 = vld [vmem:[#allocation10 + $0x138] sm:$0xff]  ;;  %v828_v52 = vpack.c.bf16 %v207_v46, %v203_v45  ;;  %v798_v53 = vpack.c.bf16 %v214_v48, %v210_v47  ;;  %v209_v54 = vld [vmem:[#allocation10 + $0x100] sm:$0xff]  ;;  %v211_v56 = vld [vmem:[#allocation10 + $0x110] sm:$0xff] }
  0x7b   :  { %793 = vmatpush1.bf16.msra.mxu0 %v792_v35  ;;  %v213_v55 = vld [vmem:[#allocation10 + $0x120] sm:$0xff]  ;;  %v830_v57 = vpack.c.bf16 %v216_v50, %v212_v49  ;;  %v215_v58 = vld [vmem:[#allocation10 + $0x130] sm:$0xff]  ;;  %v218_v59 = vld [vmem:[#allocation10 + $0x148] sm:$0xff] }
  0x7c   :  { %825 = vmatpush1.bf16.msra.mxu1 %v824_v39  ;;  %795 = vmatprep.subr.bf16.mxu0 %v794_v40  ;;  %v222_v60 = vld [vmem:[#allocation10 + $0x168] sm:$0xff]  ;;  %v220_v61 = vld [vmem:[#allocation10 + $0x158] sm:$0xff]  ;;  %v800_v63 = vpack.c.bf16 %v213_v55, %v209_v54  ;;  %v832_v1 = vpack.c.bf16 %v215_v58, %v211_v56  ;;  %v217_v3 = vld [vmem:[#allocation10 + $0x140] sm:$0xff] }
  0x7d   :  { %827 = vmatprep.subr.bf16.mxu1 %v826_v44  ;;  %v224_v62 = vld [vmem:[#allocation10 + $0x178] sm:$0xff]  ;;  %v802_v2 = vpack.c.bf16 %v222_v60, %v218_v59  ;;  %v221_v4 = vld [vmem:[#allocation10 + $0x160] sm:$0xff]  ;;  %v219_v5 = vld [vmem:[#allocation10 + $0x150] sm:$0xff] }
  0x7e   :  { %v834_v6 = vpack.c.bf16 %v224_v62, %v220_v61  ;;  %v223_v7 = vld [vmem:[#allocation10 + $0x170] sm:$0xff]  ;;  %v226_v8 = vld [vmem:[#allocation10 + $0x188] sm:$0xff]  ;;  %v228_v10 = vld [vmem:[#allocation10 + $0x198] sm:$0xff]  ;;  %v804_v12 = vpack.c.bf16 %v221_v4, %v217_v3 }
  0x7f   :  { %797 = vmatpush1.bf16.msra.mxu0 %v796_v51  ;;  %v230_v9 = vld [vmem:[#allocation10 + $0x1a8] sm:$0xff]  ;;  %v232_v11 = vld [vmem:[#allocation10 + $0x1b8] sm:$0xff]  ;;  %v836_v13 = vpack.c.bf16 %v223_v7, %v219_v5  ;;  %v225_v15 = vld [vmem:[#allocation10 + $0x180] sm:$0xff] }
  0x80   :  { %829 = vmatpush1.bf16.msra.mxu1 %v828_v52  ;;  %799 = vmatprep.subr.bf16.mxu0 %v798_v53  ;;  %v806_v14 = vpack.c.bf16 %v230_v9, %v226_v8  ;;  %v229_v16 = vld [vmem:[#allocation10 + $0x1a0] sm:$0xff]  ;;  %v227_v17 = vld [vmem:[#allocation10 + $0x190] sm:$0xff]  ;;  %v838_v18 = vpack.c.bf16 %v232_v11, %v228_v10  ;;  %v234_v20 = vld [vmem:[#allocation10 + $0x1c8] sm:$0xff] }
  0x81   :  { %831 = vmatprep.subr.bf16.mxu1 %v830_v57  ;;  %v231_v19 = vld [vmem:[#allocation10 + $0x1b0] sm:$0xff]  ;;  %v238_v21 = vld [vmem:[#allocation10 + $0x1e8] sm:$0xff]  ;;  %v236_v22 = vld [vmem:[#allocation10 + $0x1d8] sm:$0xff]  ;;  %v808_v24 = vpack.c.bf16 %v229_v16, %v225_v15 }
  0x82   :  { %v240_v23 = vld [vmem:[#allocation10 + $0x1f8] sm:$0xff]  ;;  %v840_v25 = vpack.c.bf16 %v231_v19, %v227_v17  ;;  %v810_v26 = vpack.c.bf16 %v238_v21, %v234_v20  ;;  %v233_v27 = vld [vmem:[#allocation10 + $0x1c0] sm:$0xff]  ;;  %v235_v29 = vld [vmem:[#allocation10 + $0x1d0] sm:$0xff] }
  0x83   :  { %801 = vmatpush1.bf16.msra.mxu0 %v800_v63  ;;  %v237_v28 = vld [vmem:[#allocation10 + $0x1e0] sm:$0xff]  ;;  %v842_v30 = vpack.c.bf16 %v240_v23, %v236_v22  ;;  %v239_v31 = vld [vmem:[#allocation10 + $0x1f0] sm:$0xff]  ;;  %v114_v32 = vld [vmem:[#allocation8 + $0x8] sm:$0xff] }
  0x84   :  { %833 = vmatpush1.bf16.msra.mxu1 %v832_v1  ;;  %803 = vmatprep.subr.bf16.mxu0 %v802_v2  ;;  %v118_v33 = vld [vmem:[#allocation8 + $0x28] sm:$0xff]  ;;  %v116_v34 = vld [vmem:[#allocation8 + $0x18] sm:$0xff]  ;;  %v812_v36 = vpack.c.bf16 %v237_v28, %v233_v27  ;;  %v844_v37 = vpack.c.bf16 %v239_v31, %v235_v29  ;;  %v113_v39 = vld [vmem:[#allocation8] sm:$0xff] }
  0x85   :  { %835 = vmatprep.subr.bf16.mxu1 %v834_v6  ;;  %v120_v35 = vld [vmem:[#allocation8 + $0x38] sm:$0xff]  ;;  %v846_v38 = vpack.c.bf16 %v118_v33, %v114_v32  ;;  %v117_v40 = vld [vmem:[#allocation8 + $0x20] sm:$0xff]  ;;  %v115_v41 = vld [vmem:[#allocation8 + $0x10] sm:$0xff] }
  0x86   :  { %v878_v42 = vpack.c.bf16 %v120_v35, %v116_v34  ;;  %v119_v43 = vld [vmem:[#allocation8 + $0x30] sm:$0xff]  ;;  %v122_v44 = vld [vmem:[#allocation8 + $0x48] sm:$0xff]  ;;  %v124_v46 = vld [vmem:[#allocation8 + $0x58] sm:$0xff]  ;;  %v848_v49 = vpack.c.bf16 %v117_v40, %v113_v39 }
  0x87   :  { %805 = vmatpush1.bf16.msra.mxu0 %v804_v12  ;;  %v126_v45 = vld [vmem:[#allocation8 + $0x68] sm:$0xff]  ;;  %v128_v47 = vld [vmem:[#allocation8 + $0x78] sm:$0xff]  ;;  %v111_v48 = vld [vmem:[#allocation5] sm:$0xff]  ;;  %v880_v50 = vpack.c.bf16 %v119_v43, %v115_v41 }
  0x88   :  { %837 = vmatpush1.bf16.msra.mxu1 %v836_v13  ;;  %807 = vmatprep.subr.bf16.mxu0 %v806_v14  ;;  %v850_v51 = vpack.c.bf16 %v126_v45, %v122_v44  ;;  %v121_v52 = vld [vmem:[#allocation8 + $0x40] sm:$0xff]  ;;  %v123_v54 = vld [vmem:[#allocation8 + $0x50] sm:$0xff]  ;;  %v882_v55 = vpack.c.bf16 %v128_v47, %v124_v46  ;;  %v130_v57 = vld [vmem:[#allocation8 + $0x88] sm:$0xff] }
  0x89   :  { %839 = vmatprep.subr.bf16.mxu1 %v838_v18  ;;  %v125_v53 = vld [vmem:[#allocation8 + $0x60] sm:$0xff]  ;;  %v127_v56 = vld [vmem:[#allocation8 + $0x70] sm:$0xff]  ;;  %v134_v58 = vld [vmem:[#allocation8 + $0xa8] sm:$0xff] }
  0x8a   :  { %v132_v59 = vld [vmem:[#allocation8 + $0x98] sm:$0xff]  ;;  %v852_v61 = vpack.c.bf16 %v125_v53, %v121_v52  ;;  %v884_v62 = vpack.c.bf16 %v127_v56, %v123_v54  ;;  %v854_v63 = vpack.c.bf16 %v134_v58, %v130_v57  ;;  %v129_v1 = vld [vmem:[#allocation8 + $0x80] sm:$0xff]  ;;  %v131_v3 = vld [vmem:[#allocation8 + $0x90] sm:$0xff] }
  0x8b   :  { %809 = vmatpush1.bf16.msra.mxu0 %v808_v24  ;;  %v136_v60 = vld [vmem:[#allocation8 + $0xb8] sm:$0xff]  ;;  %v133_v2 = vld [vmem:[#allocation8 + $0xa0] sm:$0xff]  ;;  %v135_v5 = vld [vmem:[#allocation8 + $0xb0] sm:$0xff] }
  0x8c   :  { %841 = vmatpush1.bf16.msra.mxu1 %v840_v25  ;;  %811 = vmatprep.subr.bf16.mxu0 %v810_v26  ;;  %v886_v4 = vpack.c.bf16 %v136_v60, %v132_v59  ;;  %v138_v6 = vld [vmem:[#allocation8 + $0xc8] sm:$0xff]  ;;  %v140_v8 = vld [vmem:[#allocation8 + $0xd8] sm:$0xff]  ;;  %v856_v10 = vpack.c.bf16 %v133_v2, %v129_v1  ;;  %v888_v11 = vpack.c.bf16 %v135_v5, %v131_v3  ;;  %v137_v13 = vld [vmem:[#allocation8 + $0xc0] sm:$0xff] }
  0x8d   :  { %843 = vmatprep.subr.bf16.mxu1 %v842_v30  ;;  %v142_v7 = vld [vmem:[#allocation8 + $0xe8] sm:$0xff]  ;;  %v144_v9 = vld [vmem:[#allocation8 + $0xf8] sm:$0xff]  ;;  %v141_v14 = vld [vmem:[#allocation8 + $0xe0] sm:$0xff] }
  0x8e   :  { %v858_v12 = vpack.c.bf16 %v142_v7, %v138_v6  ;;  %v139_v15 = vld [vmem:[#allocation8 + $0xd0] sm:$0xff]  ;;  %v890_v16 = vpack.c.bf16 %v144_v9, %v140_v8  ;;  %v146_v18 = vld [vmem:[#allocation8 + $0x108] sm:$0xff]  ;;  %v148_v20 = vld [vmem:[#allocation8 + $0x118] sm:$0xff]  ;;  %v860_v22 = vpack.c.bf16 %v141_v14, %v137_v13  ;;  %v1195_v9 = vmov 0.0|0.0  }
  0x8f   :  { %813 = vmatpush1.bf16.msra.mxu0 %v812_v36  ;;  %v143_v17 = vld [vmem:[#allocation8 + $0xf0] sm:$0xff]  ;;  %v150_v19 = vld [vmem:[#allocation8 + $0x128] sm:$0xff]  ;;  %v152_v21 = vld [vmem:[#allocation8 + $0x138] sm:$0xff] }
  0x90   :  { %845 = vmatpush1.bf16.msra.mxu1 %v844_v37  ;;  %847 = vmatprep.subr.bf16.mxu0 %v846_v38  ;;  %v892_v23 = vpack.c.bf16 %v143_v17, %v139_v15  ;;  %v862_v24 = vpack.c.bf16 %v150_v19, %v146_v18  ;;  %v145_v25 = vld [vmem:[#allocation8 + $0x100] sm:$0xff]  ;;  %v147_v27 = vld [vmem:[#allocation8 + $0x110] sm:$0xff]  ;;  %v894_v28 = vpack.c.bf16 %v152_v21, %v148_v20  ;;  %v154_v30 = vld [vmem:[#allocation8 + $0x148] sm:$0xff] }
  0x91   :  { %879 = vmatprep.subr.bf16.mxu1 %v878_v42  ;;  %v149_v26 = vld [vmem:[#allocation8 + $0x120] sm:$0xff]  ;;  %v151_v29 = vld [vmem:[#allocation8 + $0x130] sm:$0xff]  ;;  %v158_v31 = vld [vmem:[#allocation8 + $0x168] sm:$0xff] }
  0x92   :  { %306 = vmatmul.mubr.f32.vlgmr.msra.gmra.mrb[0].mxu0 %v111_v48  ;;  %v156_v32 = vld [vmem:[#allocation8 + $0x158] sm:$0xff]  ;;  %v864_v34 = vpack.c.bf16 %v149_v26, %v145_v25  ;;  %v896_v35 = vpack.c.bf16 %v151_v29, %v147_v27  ;;  %v866_v36 = vpack.c.bf16 %v158_v31, %v154_v30  ;;  %v153_v37 = vld [vmem:[#allocation8 + $0x140] sm:$0xff]  ;;  %v155_v39 = vld [vmem:[#allocation8 + $0x150] sm:$0xff]  ;;  %v527_v31 = vlaneseq }
  0x93   :  { %377 = vmatmul.mubr.f32.vlgmr.msra.gmra.mrb[0].mxu1 %v111_v48  ;;  %849 = vmatpush1.bf16.msra.mxu0 %v848_v49  ;;  %v160_v33 = vld [vmem:[#allocation8 + $0x178] sm:$0xff]  ;;  %v157_v38 = vld [vmem:[#allocation8 + $0x160] sm:$0xff]  ;;  %v159_v41 = vld [vmem:[#allocation8 + $0x170] sm:$0xff] }
  0x94   :  { %881 = vmatpush1.bf16.msra.mxu1 %v880_v50  ;;  %851 = vmatprep.subr.bf16.mxu0 %v850_v51  ;;  %v898_v40 = vpack.c.bf16 %v160_v33, %v156_v32  ;;  %v162_v42 = vld [vmem:[#allocation8 + $0x188] sm:$0xff]  ;;  %v164_v44 = vld [vmem:[#allocation8 + $0x198] sm:$0xff]  ;;  %v868_v46 = vpack.c.bf16 %v157_v38, %v153_v37  ;;  %v900_v47 = vpack.c.bf16 %v159_v41, %v155_v39  ;;  %v161_v49 = vld [vmem:[#allocation8 + $0x180] sm:$0xff]  ;;  %v528_v32 = vshrl.u32 %v527_v31, 7 }
  0x95   :  { %883 = vmatprep.subr.bf16.mxu1 %v882_v55  ;;  %447 = vmatprep.mubr.f32.mxu0 %v1194_v0  ;;  %v166_v43 = vld [vmem:[#allocation8 + $0x1a8] sm:$0xff]  ;;  %v168_v45 = vld [vmem:[#allocation8 + $0x1b8] sm:$0xff]  ;;  %v165_v50 = vld [vmem:[#allocation8 + $0x1a0] sm:$0xff] }
  0x96   :  { %518 = vmatprep.mubr.f32.mxu1 %v1194_v0  ;;  %v870_v48 = vpack.c.bf16 %v166_v43, %v162_v42  ;;  %v163_v51 = vld [vmem:[#allocation8 + $0x190] sm:$0xff]  ;;  %v902_v52 = vpack.c.bf16 %v168_v45, %v164_v44  ;;  %v170_v54 = vld [vmem:[#allocation8 + $0x1c8] sm:$0xff]  ;;  %v172_v56 = vld [vmem:[#allocation8 + $0x1d8] sm:$0xff]  ;;  %v872_v58 = vpack.c.bf16 %v165_v50, %v161_v49  ;;  %v529_v33 = vsub.s32 0, %v528_v32 }
  0x97   :  { %853 = vmatpush1.bf16.msra.mxu0 %v852_v61  ;;  %v167_v53 = vld [vmem:[#allocation8 + $0x1b0] sm:$0xff]  ;;  %v174_v55 = vld [vmem:[#allocation8 + $0x1e8] sm:$0xff]  ;;  %v176_v57 = vld [vmem:[#allocation8 + $0x1f8] sm:$0xff]  ;;  %v541_v38 = vsub.s32 3, %v528_v32 }
  0x98   :  { %885 = vmatpush1.bf16.msra.mxu1 %v884_v62  ;;  %855 = vmatprep.subr.bf16.mxu0 %v854_v63  ;;  %v904_v59 = vpack.c.bf16 %v167_v53, %v163_v51  ;;  %v874_v60 = vpack.c.bf16 %v174_v55, %v170_v54  ;;  %v169_v61 = vld [vmem:[#allocation8 + $0x1c0] sm:$0xff]  ;;  %v906_v63 = vpack.c.bf16 %v176_v57, %v172_v56  ;;  %v171_v1 = vld [vmem:[#allocation8 + $0x1d0] sm:$0xff]  ;;  %v110_v5 = vld [vmem:[#allocation2] sm:$0xff] }
  0x99   :  { %887 = vmatprep.subr.bf16.mxu1 %v886_v4  ;;  %v173_v62 = vld [vmem:[#allocation8 + $0x1e0] sm:$0xff]  ;;  %v175_v2 = vld [vmem:[#allocation8 + $0x1f0] sm:$0xff]  ;;  %v576_v7 = vld [vmem:[#allocation11 + $0x8] sm:$0xff] }
  0x9a   :  { %v876_v3 = vpack.c.bf16 %v173_v62, %v169_v61  ;;  %v908_v4 = vpack.c.bf16 %v175_v2, %v171_v1  ;;  %v575_v6 = vld [vmem:[#allocation11] sm:$0xff]  ;;  %v580_v14 = vld [vmem:[#allocation11 + $0x28] sm:$0xff]  ;;  %v582_v17 = vld [vmem:[#allocation11 + $0x38] sm:$0xff] }
  0x9b   :  { %857 = vmatpush1.bf16.msra.mxu0 %v856_v10  ;;  %v911_v8 = vpack.c.bf16 %v576_v7, %v575_v6  ;;  %v577_v10 = vld [vmem:[#allocation11 + $0x10] sm:$0xff]  ;;  %v579_v13 = vld [vmem:[#allocation11 + $0x20] sm:$0xff]  ;;  %v584_v20 = vld [vmem:[#allocation11 + $0x48] sm:$0xff] }
  0x9c   :  { %889 = vmatpush1.bf16.msra.mxu1 %v888_v11  ;;  %859 = vmatprep.subr.bf16.mxu0 %v858_v12  ;;  %v578_v11 = vld [vmem:[#allocation11 + $0x18] sm:$0xff]  ;;  %v917_v15 = vpack.c.bf16 %v580_v14, %v579_v13  ;;  %v583_v19 = vld [vmem:[#allocation11 + $0x40] sm:$0xff]  ;;  %v588_v26 = vld [vmem:[#allocation11 + $0x68] sm:$0xff] }
  0x9d   :  { %891 = vmatprep.subr.bf16.mxu1 %v890_v16  ;;  %v914_v12 = vpack.c.bf16 %v578_v11, %v577_v10  ;;  %v581_v16 = vld [vmem:[#allocation11 + $0x30] sm:$0xff]  ;;  %v923_v21 = vpack.c.bf16 %v584_v20, %v583_v19  ;;  %v590_v29 = vld [vmem:[#allocation11 + $0x78] sm:$0xff] }
  0x9e   :  { %v920_v18 = vpack.c.bf16 %v582_v17, %v581_v16 }
  0x9f   :  { %861 = vmatpush1.bf16.msra.mxu0 %v860_v22  ;;  %v585_v22 = vld [vmem:[#allocation11 + $0x50] sm:$0xff] }
  0xa0   :  { %893 = vmatpush1.bf16.msra.mxu1 %v892_v23  ;;  %863 = vmatprep.subr.bf16.mxu0 %v862_v24  ;;  %v586_v23 = vld [vmem:[#allocation11 + $0x58] sm:$0xff]  ;;  %v587_v24 = vld [vmem:[#allocation11 + $0x60] sm:$0xff] }
  0xa1   :  { %895 = vmatprep.subr.bf16.mxu1 %v894_v28  ;;  %v926_v25 = vpack.c.bf16 %v586_v23, %v585_v22  ;;  %v929_v27 = vpack.c.bf16 %v588_v26, %v587_v24  ;;  %v589_v28 = vld [vmem:[#allocation11 + $0x70] sm:$0xff] }
  0xa2   :  { %v932_v30 = vpack.c.bf16 %v590_v29, %v589_v28 }
  0xa3   :  { %865 = vmatpush1.bf16.msra.mxu0 %v864_v34  ;;  %v525_v34 = vld [vmem:[%s1399_s5] sm:$0xf] }
  0xa4   :  { %897 = vmatpush1.bf16.msra.mxu1 %v896_v35  ;;  %867 = vmatprep.subr.bf16.mxu0 %v866_v36  ;;  %v533_v35 = vsub.s32 1, %v528_v32  ;;  %v530_v36 = vrot.slane %v525_v34, %v529_v33 }
  0xa5   :  { %899 = vmatprep.subr.bf16.mxu1 %v898_v40 }
  0xa6   :  { %v534_v37 = vrot.slane %v525_v34, %v533_v35 }
  0xa7   :  { %869 = vmatpush1.bf16.msra.mxu0 %v868_v46  ;;  %v542_v46 = vrot.slane %v525_v34, %v541_v38 }
  0xa8   :  { %901 = vmatpush1.bf16.msra.mxu1 %v900_v47  ;;  %871 = vmatprep.subr.bf16.mxu0 %v870_v48  ;;  %v537_v47 = vsub.s32 2, %v528_v32 }
  0xa9   :  { %903 = vmatprep.subr.bf16.mxu1 %v902_v52 }
  0xaa   :  { %v538_v49 = vrot.slane %v525_v34, %v537_v47 }
  0xab   :  { %873 = vmatpush1.bf16.msra.mxu0 %v872_v58  ;;  %v112_v58 = vld [vmem:[#allocation7] sm:$0xff] }
  0xac   :  { %905 = vmatpush1.bf16.msra.mxu1 %v904_v59  ;;  %875 = vmatprep.subr.bf16.mxu0 %v874_v60 }
  0xad   :  { %907 = vmatprep.subr.bf16.mxu1 %v906_v63 }
  0xaf   :  { %877 = vmatpush1.bf16.msra.mxu0 %v876_v3 }
  0xb0   :  { %909 = vmatpush1.bf16.msra.mxu1 %v908_v4  ;;  %910 = vmatprep.subr.bf16.mxu0 %v1195_v9 }
  0xb2   :  { %448 = vmatmul.mubr.f32.vlgmr.msra.gmra.mrb[0].mxu0 %v110_v5 }
  0xb3   :  { %519 = vmatmul.mubr.f32.vlgmr.msra.gmra.mrb[0].mxu1 %v110_v5  ;;  %912 = vmatpush3.bf16.msra.mxu0 %v911_v8  ;;  %v729_v5 = vld [vmem:[%s1401_s7] ss:$0 sm:$0xff] }
  0xb4   :  { %913 = vmatprep.subr.bf16.mxu0 %v1195_v9  ;;  %779 = vmatprep.mubr.msk.f32.mxu0 %vm1196_vm0, %v1194_v0 }
  0xb7   :  { %915 = vmatpush3.bf16.msra.mxu0 %v914_v12 }
  0xb8   :  { %916 = vmatprep.subr.bf16.mxu0 %v1195_v9 }
  0xbb   :  { %918 = vmatpush3.bf16.msra.mxu0 %v917_v15 }
  0xbc   :  { %919 = vmatprep.subr.bf16.mxu0 %v1195_v9 }
  0xbf   :  { %921 = vmatpush3.bf16.msra.mxu0 %v920_v18 }
  0xc0   :  { %922 = vmatprep.subr.bf16.mxu0 %v1195_v9 }
  0xc3   :  { %924 = vmatpush3.bf16.msra.mxu0 %v923_v21 }
  0xc4   :  { %925 = vmatprep.subr.bf16.mxu0 %v1195_v9 }
  0xc7   :  { %927 = vmatpush3.bf16.msra.mxu0 %v926_v25 }
  0xc8   :  { %928 = vmatprep.subr.bf16.mxu0 %v1195_v9 }
  0xcb   :  { %930 = vmatpush3.bf16.msra.mxu0 %v929_v27 }
  0xcc   :  { %931 = vmatprep.subr.bf16.mxu0 %v1195_v9 }
  0xcf   :  { %933 = vmatpush3.bf16.msra.mxu0 %v932_v30 }
 0x185   :  { %v449_v0 = vpop.f32.mrb[0].mxu0 }
 0x186   :  { %v547_v39 = vadd.f32 %v530_v36, %v449_v0  ;;  %v520_v40 = vpop.f32.mrb[0].mxu1  ;;  %v451_v41 = vpop.f32.mrb[1].mxu0 }
 0x187   :  { %v548_v42 = vadd.f32 %v534_v37, %v451_v41  ;;  %v522_v43 = vpop.f32.mrb[1].mxu1  ;;  %v549_v51 = vadd.f32 %v538_v49, %v520_v40 }
 0x188   :  { %v726_v44 = vmul.f32 -1.442695, %v547_v39  ;;  %v550_v48 = vadd.f32 %v542_v46, %v522_v43 }
 0x189   :  { %v727_v45 = vmul.f32 -1.442695, %v548_v42 }
 0x18a   :  { %954 = vpow2.f32 %v726_v44  ;;  %v728_v50 = vmul.f32 -1.442695, %v550_v48 }
 0x18b   :  { %956 = vpow2.f32 %v727_v45 }
 0x18c   :  { %958 = vpow2.f32 %v728_v50 }
 0x18d   :  { %960 = vtanh.f32 %v549_v51 }
 0x194   :  { %v955_v52 = vpop.eup %954 }
 0x195   :  { %v957_v53 = vpop.eup %956  ;;  %v554_v54 = vadd.f32 1.0, %v955_v52 }
 0x196   :  { %v560_v55 = vadd.f32 1.0, %v957_v53  ;;  %v959_v56 = vpop.eup %958 }
 0x197   :  { %962 = vrcp.f32 %v554_v54  ;;  %v961_v57 = vpop.eup %960  ;;  %v567_v62 = vadd.f32 1.0, %v959_v56 }
 0x198   :  { %964 = vrcp.f32 %v560_v55 }
 0x199   :  { %966 = vrcp.f32 %v567_v62 }
 0x1a1   :  { %v963_v59 = vpop.eup %962 }
 0x1a2   :  { %v965_v60 = vpop.eup %964  ;;  %v571_v61 = vmul.f32 %v963_v59, %v961_v57 }
 0x1a3   :  { %v570_v63 = vmul.f32 %v965_v60, %v112_v58  ;;  %v967_v2 = vpop.eup %966 }
 0x1a5   :  { %v572_v1 = vadd.f32 %v571_v61, %v570_v63 }
 0x1a7   :  { %680 = vst [vmem:[#allocation16] sm:$0xff] %v572_v1  ;;  %968 = vtanh.f32 %v572_v1 }
 0x1b1   :  { %v969_v3 = vpop.eup %968 }
 0x1b2   :  { %v574_v4 = vmul.f32 %v969_v3, %v967_v2 }
 0x1b4   :  { %780 = vmatmul.mubr.f32.vlgmr.msra.gmra.mrb[2].mxu0 %v574_v4  ;;  %679 = vst [vmem:[#allocation14] sm:$0xff] %v574_v4 }
 0x287   :  { %v664_v6 = vpop.f32.mrb[2].mxu0 }
 0x288   :  { %v665_v7 = vadd.f32 %v729_v5, %v664_v6  ;;  %v781_v8 = vpop.f32.mrb[3].mxu0 }
 0x28a   :  { %668 = vmax.xlane.f32.xlu0 %v665_v7 }
 0x317   :  { %v669_v9 = vpop.xlane.xlu0 %668 }
 0x318   :  { %v670_v10 = vsub.f32 %v665_v7, %v669_v9 }
 0x31a   :  { %v671_v11 = vmul.f32 1.442695, %v670_v10 }
 0x31c   :  { %970 = vpow2.f32 %v671_v11 }
 0x326   :  { %v971_v12 = vpop.eup %970 }
 0x327   :  { %673 = vadd.xlane.f32.xlu0 %v971_v12 }
 0x328   :  { %1117 = shalt.err (!%p1114_p10)
}
 0x329   :  { %s1118_s3 = scalar_lea.hbm %s1403_s9, 128 }
 0x32a   :  { %p1119_p11 = scmp.ne.s32.totalorder %s1403_s9, %s1118_s3  ;;  %p1122_p12 = scmp.lt.u32.totalorder %s1118_s3, %s1403_s9 }
 0x32c   :  { %p1124_p13 = pnand %p1122_p12, %p1119_p11 }
 0x32e   :  { %1127 = shalt.err (!%p1124_p13)
}
 0x32f   :  { %700 = dma.vmem_to_hbm [thread:$0]  %s698_s27, 128, %s1403_s9, [#allocation15]  }
 0x330   :  { %s1198_s13 = smov [#allocation16]  }
 0x331   :  { %s707_s15 = sshll.u32 %s1198_s13, 4  ;;  %s708_s15 = int_to_ptr.vmem [resolvable:$true] %s707_s15 }
 0x332   :  { %s1128_s17 = scalar_lea.vmem %s708_s15, 128  ;;  %p1133_p1 = scmp.lt.s32.totalorder %s708_s15, %s708_s15 }
 0x333   :  { %p1129_p0 = scmp.ne.s32.totalorder %s708_s15, %s1128_s17  ;;  %p1134_p2 = scmp.lt.s32.totalorder %s1128_s17, %s1128_s17 }
 0x335   :  { %p1135_p3 = por %p1134_p2, %p1133_p1 }
 0x337   :  { %p1136_p4 = pnand %p1135_p3, %p1129_p0 }
 0x339   :  { %1139 = shalt.err (!%p1136_p4)
}
 0x33a   :  { %s1140_s21 = scalar_lea.hbm %s1404_s10, 128 }
 0x33b   :  { %p1141_p5 = scmp.ne.s32.totalorder %s1404_s10, %s1140_s21  ;;  %p1144_p6 = scmp.lt.u32.totalorder %s1140_s21, %s1404_s10 }
 0x33d   :  { %p1146_p7 = pnand %p1144_p6, %p1141_p5 }
 0x33f   :  { %1149 = shalt.err (!%p1146_p7)
}
 0x340   :  { %710 = dma.vmem_to_hbm [thread:$0]  %s708_s15, 128, %s1404_s10, [#allocation15]  }
 0x341   :  { %s1199_s23 = smov [#allocation13]  }
 0x342   :  { %s687_s6 = sshll.u32 %s1199_s23, 4  ;;  %s688_s6 = int_to_ptr.vmem [resolvable:$true] %s687_s6 }
 0x343   :  { %s1150_s24 = scalar_lea.vmem %s688_s6, 128  ;;  %p1155_p9 = scmp.lt.s32.totalorder %s688_s6, %s688_s6 }
 0x344   :  { %p1151_p8 = scmp.ne.s32.totalorder %s688_s6, %s1150_s24  ;;  %p1156_p10 = scmp.lt.s32.totalorder %s1150_s24, %s1150_s24 }
 0x346   :  { %p1157_p11 = por %p1156_p10, %p1155_p9 }
 0x348   :  { %p1158_p12 = pnand %p1157_p11, %p1151_p8 }
 0x3b4   :  { %v674_v13 = vpop.xlane.xlu0 %673 }
 0x3b5   :  { %972 = vlog2.f32 %v674_v13 }
 0x3bf   :  { %v973_v14 = vpop.eup %972 }
 0x3c0   :  { %v676_v15 = vmul.f32 0.6931472, %v973_v14 }
 0x3c2   :  { %v677_v16 = vsub.f32 %v670_v10, %v676_v15 }
 0x3c4   :  { %678 = vst [vmem:[#allocation13] sm:$0xff] %v677_v16 }
 0x3c5   :  { %1161 = shalt.err (!%p1158_p12)
}
 0x3c6   :  { %s1162_s10 = scalar_lea.hbm %s1402_s8, 128 }
 0x3c7   :  { %p1163_p13 = scmp.ne.s32.totalorder %s1402_s8, %s1162_s10  ;;  %p1166_p0 = scmp.lt.u32.totalorder %s1162_s10, %s1402_s8 }
 0x3c9   :  { %p1168_p1 = pnand %p1166_p0, %p1163_p13 }
 0x3cb   :  { %1171 = shalt.err (!%p1168_p1)
}
 0x3cc   :  { %690 = dma.vmem_to_hbm [thread:$0]  %s688_s6, 128, %s1402_s8, [#allocation4]  }
 0x3cd   :  { %1180 = dma.done.wait [#allocation4], 128  }
 0x3ce   :  { %1181 = vsyncadd [#allocation4], 4294967168 }
 0x3cf   :  { %1182 = dma.done.wait [#allocation15], 256  }
 0x3d0   :  { %1183 = vsyncadd [#allocation15], 4294967040 }
 0x3d1   :  { %720 = vsyncpa [#allocation3], 1 }
 0x3d2   :  { %721 = vsyncpa [#allocation6], 1 }
 0x3d3   :  { %722 = vsyncpa [#allocation9], 1 }
 0x3d4   :  { %723 = vsyncpa [#allocation12], 1 }
 0x3d5   :  { %724 = vsyncpa [#allocation4], 1 }
 0x3d6   :  { %725 = vsyncpa [#allocation15], 1 }

</bundles_post_ra>
